<compile_context>
chip_gen: v5e
topology: v5e:2x2
jax: 0.10.0
libtpu: 0.0.40
codegen_flags: <defaults>
</compile_context>

<pallas_src>
import jax
import jax.numpy as jnp
from jax import lax
from jax.experimental import pallas as pl
from jax.experimental.pallas import tpu as pltpu

# ---------------- tunables (sized to fit v5e/v6e 128 MiB and v7x 64 MiB VMEM) --
_MAX_TOK_BLOCK = 2048                     # max tokens per grid step
_DMA_TILE_BYTES = 8 * 1024 * 1024         # (tok, D) tile; x4 live (scratch+out)
_MAX_IDS_PER_CALL = 128 * 1024            # int32 ids in SMEM (512 KiB padded)
_VMEM_LIMIT_BYTES = 48 * 1024 * 1024      # scoped VMEM limit, safe on v7x
_ONEHOT_MAX_TABLE_BYTES = 12 * 1024 * 1024
_ONEHOT_MAX_VOCAB_W16 = 8192              # bf16/fp16 tables
_ONEHOT_MAX_VOCAB_W32 = 4096              # f32 tables (v5e MXU f32 is slower)
_ONEHOT_SMALL_ROW_BYTES = 1024            # rows this small are DMA-descriptor bound
_ONEHOT_SELECT_BYTES = 3 * 1024 * 1024    # cap on (tok, V) iota/one-hot intermediates
_ONEHOT_TILE_BYTES = 4 * 1024 * 1024      # cap on (tok, D) output tile (one-hot path)


def _round_up(x, m):
    return ((x + m - 1) // m) * m


def _sublane(itemsize):
    # dtype-native sublane multiple: 8 for 4-byte, 16 for 2-byte, 32 for 1-byte
    return max(8, 32 // max(1, itemsize))


def _pick_tok(n, align, tok_cap):
    """Pick a token-block size: as large as the VMEM caps allow, sublane
    aligned, and preferring >= 2 grid steps so 'parallel' axes can split
    across v7x's two TensorCores."""
    n_al = _round_up(max(int(n), 1), align)
    tok = max(align, min(int(tok_cap), _MAX_TOK_BLOCK, n_al))
    tok = max(align, (tok // align) * align)
    if n_al >= 2 * align:
        tok = min(tok, max(align, ((n_al // 2) // align) * align))
    return tok


# ---------------------------------------------------------------------------
# Path 1: small table resident in VMEM, gather via one-hot matmul (MXU).
# ---------------------------------------------------------------------------
def _embedding_onehot_kernel(ids_ref, w_ref, o_ref):
    ids = ids_ref[...]                                   # (T, 1) int32
    T = o_ref.shape[0]
    V = w_ref.shape[0]
    cols = lax.broadcasted_iota(jnp.int32, (T, V), 1)    # (T, V)
    onehot = (cols == ids).astype(w_ref.dtype)           # (T, V)
    # One-hot selection is exact in any dtype (a single 1.0 per row), so
    # accumulate directly in the output dtype -> no f32 intermediate + recast.
    o_ref[...] = jnp.dot(onehot, w_ref[...], preferred_element_type=o_ref.dtype)


def _embedding_onehot(weight, flat_ids, n):
    V, D = weight.shape
    itemsize = weight.dtype.itemsize
    align = _sublane(itemsize)
    tok_cap = min(_ONEHOT_SELECT_BYTES // max(1, V * 4),          # iota/one-hot
                  _ONEHOT_TILE_BYTES // max(1, D * itemsize))     # output tile
    tok = _pick_tok(n, align, tok_cap)
    n_pad = _round_up(n, tok)
    ids = flat_ids if n_pad == n else jnp.pad(flat_ids, (0, n_pad - n))
    ids2d = ids[:, None]                                  # (n_pad, 1)

    def build(w_spec):
        return pl.pallas_call(
            _embedding_onehot_kernel,
            out_shape=jax.ShapeDtypeStruct((n_pad, D), weight.dtype),
            grid_spec=pltpu.PrefetchScalarGridSpec(
                num_scalar_prefetch=0,
                grid=(n_pad // tok,),
                in_specs=[pl.BlockSpec((tok, 1), lambda i: (i, 0)), w_spec],
                out_specs=pl.BlockSpec((tok, D), lambda i: (i, 0)),
            ),
            compiler_params=pltpu.CompilerParams(
                dimension_semantics=("parallel",),        # megacore-friendly
                vmem_limit_bytes=_VMEM_LIMIT_BYTES,
            ),
        )(ids2d, weight)

    try:
        # Constant-index (resident) table: single-buffer it -> half the VMEM
        # footprint, which matters on v7x's 64 MiB/TC.
        out = build(pl.BlockSpec((V, D), lambda i: (0, 0),
                                 pipeline_mode=pl.Buffered(1)))
    except Exception:
        # pipeline_mode / Buffered(1) not supported by this jax version:
        # fall back to default (double) buffering; thresholds still fit.
        out = build(pl.BlockSpec((V, D), lambda i: (0, 0)))
    return out if n_pad == n else out[:n]


# ---------------------------------------------------------------------------
# Path 2: table in HBM, double-buffered per-row DMA gather.
# ---------------------------------------------------------------------------
def _embedding_dma_kernel(ids_ref, w_hbm, o_ref, buf, sem):
    """grid = (outer['parallel'], inner['arbitrary']).

    ids_ref : SMEM (scalar prefetch), (N,) int32 token ids
    w_hbm   : HBM (pl.ANY), (V, D) embedding table
    o_ref   : VMEM, (T, D) output tile for block (outer*inner + i)
    buf     : VMEM scratch (2, T, D) -- gather double-buffer
    sem     : DMA semaphores (2,), one per buffer slot
    """
    o = pl.program_id(0)
    i = pl.program_id(1)
    n_inner = pl.num_programs(1)
    T = o_ref.shape[0]
    first_blk = o * n_inner

    def issue_block(blk, slot):
        base = blk * T

        def issue(t, carry):
            row = ids_ref[base + t]
            pltpu.make_async_copy(w_hbm.at[row], buf.at[slot, t],
                                  sem.at[slot]).start()
            return carry

        lax.fori_loop(0, T, issue, 0, unroll=8)

    # Prime the pipeline once per outer index (runs on every core even when
    # the outer axis is split across TensorCores -> megacore-safe).
    @pl.when(i == 0)
    def _():
        issue_block(first_blk, 0)

    # Look ahead: start block i+1's gather before waiting on block i, so its
    # descriptor issue + HBM latency overlap with block i's wait/writeback.
    @pl.when(i + 1 < n_inner)
    def _():
        issue_block(first_blk + i + 1, (i + 1) % 2)

    slot = i % 2
    # Counted wait: DMA semaphores count bytes; the T row copies into
    # buf[slot] total exactly bytes(buf[slot]) = T*D*itemsize.  buf/out dtype
    # == weight dtype by construction, so the byte totals match.
    pltpu.make_async_copy(buf.at[slot], buf.at[slot], sem.at[slot]).wait()
    o_ref[...] = buf[slot]


def _embedding_dma(weight, flat_ids, n):
    V, D = weight.shape
    itemsize = weight.dtype.itemsize
    align = _sublane(itemsize)
    row_bytes = D * itemsize
    tok = _pick_tok(n, align, _DMA_TILE_BYTES // max(1, row_bytes))

    blocks = _round_up(n, tok) // tok
    # In-kernel pipeline depth (inner axis).  Keep padding waste (<= inner-1
    # blocks of wasted row-0 gathers) bounded to ~12%.
    if blocks >= 8 and (_round_up(blocks, 4) - blocks) * 8 <= blocks:
        inner = 4
    elif blocks >= 2:
        inner = 2
    else:
        inner = 1
    blocks_pad = _round_up(blocks, inner)
    n_pad = blocks_pad * tok
    ids = flat_ids if n_pad == n else jnp.pad(flat_ids, (0, n_pad - n))

    def call(ids_c):
        n_outer = ids_c.shape[0] // (inner * tok)
        return pl.pallas_call(
            _embedding_dma_kernel,
            out_shape=jax.ShapeDtypeStruct((ids_c.shape[0], D), weight.dtype),
            grid_spec=pltpu.PrefetchScalarGridSpec(
                num_scalar_prefetch=1,                         # ids -> SMEM
                grid=(n_outer, inner),
                in_specs=[pl.BlockSpec(memory_space=pl.ANY)],  # table in HBM
                out_specs=pl.BlockSpec(
                    (tok, D), lambda o, i, ids_r: (o * inner + i, 0)),
                scratch_shapes=[
                    pltpu.VMEM((2, tok, D), weight.dtype),     # gather buffers
                    pltpu.SemaphoreType.DMA((2,)),
                ],
            ),
            compiler_params=pltpu.CompilerParams(
                dimension_semantics=("parallel", "arbitrary"),
                vmem_limit_bytes=_VMEM_LIMIT_BYTES,
            ),
        )(ids_c, weight)

    if n_pad <= _MAX_IDS_PER_CALL:
        out = call(ids)                       # common case: one call, no concat
    else:
        # Only for extremely large batch*seq (> _MAX_IDS_PER_CALL tokens):
        # chunk so the scalar-prefetched id array stays within SMEM.
        step = max(1, _MAX_IDS_PER_CALL // (inner * tok)) * inner * tok
        outs = [call(ids[s:s + step]) for s in range(0, n_pad, step)]
        out = jnp.concatenate(outs, axis=0)
    return out if n_pad == n else out[:n]


# ---------------------------------------------------------------------------
# Public wrapper: JAX equivalent of StatelessEmbedding.forward(weight, input)
# ---------------------------------------------------------------------------
def stateless_embedding(weight, ids, *, force_path=None):
    """out[..., :] = weight[ids[...], :]  (F.embedding with nn.Embedding defaults)."""
    V, D = weight.shape
    orig_shape = tuple(ids.shape)
    # Clamp ids so an out-of-range id cannot trigger an out-of-bounds DMA
    # (which would hard-fault the chip rather than raise).
    flat = jnp.clip(ids.reshape(-1).astype(jnp.int32), 0, V - 1)
    n = flat.shape[0]

    itemsize = weight.dtype.itemsize
    table_bytes = V * D * itemsize
    row_bytes = D * itemsize
    max_vocab = _ONEHOT_MAX_VOCAB_W16 if itemsize <= 2 else _ONEHOT_MAX_VOCAB_W32
    use_onehot = (force_path == "onehot") or (
        force_path is None
        and table_bytes <= _ONEHOT_MAX_TABLE_BYTES
        and (V <= max_vocab or row_bytes <= _ONEHOT_SMALL_ROW_BYTES))

    if use_onehot:
        out = _embedding_onehot(weight, flat, n)
    else:
        out = _embedding_dma(weight, flat, n)
    return out.reshape(orig_shape + (D,))


if __name__ == "__main__":
    # Deterministic synthetic parameters mirroring nn.Embedding(V, D) with
    # default padding_idx=None, max_norm=None -> forward is a pure gather.
    num_embeddings = 32   # vocab size V
    embedding_dim = 32    # hidden D
    batch, seq = 2, 8

    key = jax.random.PRNGKey(0)
    k_w, k_i = jax.random.split(key)
    weight = jax.random.normal(k_w, (num_embeddings, embedding_dim), dtype=jnp.float32)
    ids = jax.random.randint(k_i, (batch, seq), 0, num_embeddings, dtype=jnp.int32)

    ref = jnp.take(weight, ids, axis=0)

    # Auto-selected path (small table -> resident table / one-hot MXU gather).
    out_fast = jax.block_until_ready(stateless_embedding(weight, ids))
    assert out_fast.shape == (batch, seq, embedding_dim), out_fast.shape
    assert jnp.allclose(out_fast, ref), "one-hot path mismatch vs reference gather"

    # Large-table path (double-buffered per-row HBM DMA gather), forced for coverage.
    out_dma = jax.block_until_ready(stateless_embedding(weight, ids, force_path="dma"))
    assert out_dma.shape == (batch, seq, embedding_dim), out_dma.shape
    assert jnp.allclose(out_dma, ref), "DMA path mismatch vs reference gather"

    # TODO(synk): max_norm renormalization (an in-place torch weight rewrite) is
    # not modeled; it is None here, matching nn.Embedding defaults.
    print("KERNEL_OK")
</pallas_src>

<mosaic_0001>
module attributes {stable_mosaic.version = 11 : i64} {
  func.func @_embedding_onehot_kernel(%arg0: i32, %arg1: memref<8x1xi32, #tpu.memory_space<vmem>>, %arg2: memref<32x32xf32, #tpu.memory_space<vmem>>, %arg3: memref<8x32xf32, #tpu.memory_space<vmem>>) attributes {dimension_semantics = [#tpu.dimension_semantics<parallel>], iteration_bounds = array<i64: 2>, scalar_prefetch = 0 : i64, scratch_operands = 0 : i64, tpu.core_type = #tpu.core_type<tc>, window_params = [{transform_indices = @transform_0, window_bounds = array<i64: 8, 1>}, {pipeline_mode = #tpu.pipeline_mode<synchronous>, transform_indices = @transform_1, window_bounds = array<i64: 32, 32>}, {transform_indices = @transform_2, window_bounds = array<i64: 8, 32>}]} {
    %c0 = arith.constant 0 : index
    %c0_0 = arith.constant 0 : index
    %0 = vector.load %arg1[%c0, %c0_0] : memref<8x1xi32, #tpu.memory_space<vmem>>, vector<8x1xi32>
    %1 = tpu.iota {dimensions = array<i32: 1>} : vector<8x32xi32>
    %2 = vector.broadcast %0 : vector<8x1xi32> to vector<8x32xi32>
    %3 = arith.cmpi eq, %1, %2 : vector<8x32xi32>
    %4 = arith.extui %3 : vector<8x32xi1> to vector<8x32xi32>
    %5 = arith.sitofp %4 : vector<8x32xi32> to vector<8x32xf32>
    %c0_1 = arith.constant 0 : index
    %c0_2 = arith.constant 0 : index
    %6 = vector.load %arg2[%c0_1, %c0_2] : memref<32x32xf32, #tpu.memory_space<vmem>>, vector<32x32xf32>
    %cst = arith.constant dense<0.000000e+00> : vector<8x32xf32>
    %7 = tpu.matmul %5, %6, %cst {dimension_numbers = #tpu.dot_dimension_numbers<[1], [0], [0], [1], [0, 0, 1, 1], [], []>} : vector<8x32xf32>, vector<32x32xf32>, vector<8x32xf32> -> vector<8x32xf32>
    %c0_3 = arith.constant 0 : index
    %c0_4 = arith.constant 0 : index
    %8 = vector.load %arg3[%c0_3, %c0_4] : memref<8x32xf32, #tpu.memory_space<vmem>>, vector<8x32xf32>
    tpu.vector_store %arg3[%c0_3, %c0_4], %7 {strides = array<i32>} : memref<8x32xf32, #tpu.memory_space<vmem>>, vector<8x32xf32>,
    return
  }
  func.func @transform_0(%arg0: i32) -> (i32, i32) {
    %c0_i32 = arith.constant 0 : i32
    %c0_i32_0 = arith.constant 0 : i32
    return %arg0, %c0_i32 : i32, i32
  }
  func.func @transform_1(%arg0: i32) -> (i32, i32) {
    %c0_i32 = arith.constant 0 : i32
    %c0_i32_0 = arith.constant 0 : i32
    %c0_i32_1 = arith.constant 0 : i32
    return %c0_i32, %c0_i32_0 : i32, i32
  }
  func.func @transform_2(%arg0: i32) -> (i32, i32) {
    %c0_i32 = arith.constant 0 : i32
    %c0_i32_0 = arith.constant 0 : i32
    return %arg0, %c0_i32 : i32, i32
  }
}

module attributes {stable_mosaic.version = 11 : i64} {
  func.func @_embedding_onehot_kernel(%arg0: i32, %arg1: memref<8x1xi32, #tpu.memory_space<vmem>>, %arg2: memref<32x32xf32, #tpu.memory_space<vmem>>, %arg3: memref<8x32xf32, #tpu.memory_space<vmem>>) attributes {dimension_semantics = [#tpu.dimension_semantics<parallel>], iteration_bounds = array<i64: 2>, scalar_prefetch = 0 : i64, scratch_operands = 0 : i64, tpu.core_type = #tpu.core_type<tc>, window_params = [{transform_indices = @transform_0, window_bounds = array<i64: 8, 1>}, {pipeline_mode = #tpu.pipeline_mode<synchronous>, transform_indices = @transform_1, window_bounds = array<i64: 32, 32>}, {transform_indices = @transform_2, window_bounds = array<i64: 8, 32>}]} {
    %c0 = arith.constant 0 : index
    %c0_0 = arith.constant 0 : index
    %0 = vector.load %arg1[%c0, %c0_0] : memref<8x1xi32, #tpu.memory_space<vmem>>, vector<8x1xi32>
    %1 = tpu.iota {dimensions = array<i32: 1>} : vector<8x32xi32>
    %2 = vector.broadcast %0 : vector<8x1xi32> to vector<8x32xi32>
    %3 = arith.cmpi eq, %1, %2 : vector<8x32xi32>
    %4 = arith.extui %3 : vector<8x32xi1> to vector<8x32xi32>
    %5 = arith.sitofp %4 : vector<8x32xi32> to vector<8x32xf32>
    %c0_1 = arith.constant 0 : index
    %c0_2 = arith.constant 0 : index
    %6 = vector.load %arg2[%c0_1, %c0_2] : memref<32x32xf32, #tpu.memory_space<vmem>>, vector<32x32xf32>
    %cst = arith.constant dense<0.000000e+00> : vector<8x32xf32>
    %7 = tpu.matmul %5, %6, %cst {dimension_numbers = #tpu.dot_dimension_numbers<[1], [0], [0], [1], [0, 0, 1, 1], [], []>} : vector<8x32xf32>, vector<32x32xf32>, vector<8x32xf32> -> vector<8x32xf32>
    %c0_3 = arith.constant 0 : index
    %c0_4 = arith.constant 0 : index
    %8 = vector.load %arg3[%c0_3, %c0_4] : memref<8x32xf32, #tpu.memory_space<vmem>>, vector<8x32xf32>
    tpu.vector_store %arg3[%c0_3, %c0_4], %7 {strides = array<i32>} : memref<8x32xf32, #tpu.memory_space<vmem>>, vector<8x32xf32>,
    return
  }
  func.func @transform_0(%arg0: i32) -> (i32, i32) {
    %c0_i32 = arith.constant 0 : i32
    %c0_i32_0 = arith.constant 0 : i32
    return %arg0, %c0_i32 : i32, i32
  }
  func.func @transform_1(%arg0: i32) -> (i32, i32) {
    %c0_i32 = arith.constant 0 : i32
    %c0_i32_0 = arith.constant 0 : i32
    %c0_i32_1 = arith.constant 0 : i32
    return %c0_i32, %c0_i32_0 : i32, i32
  }
  func.func @transform_2(%arg0: i32) -> (i32, i32) {
    %c0_i32 = arith.constant 0 : i32
    %c0_i32_0 = arith.constant 0 : i32
    return %arg0, %c0_i32 : i32, i32
  }
}

</mosaic_0001>

<bundles_post_ra>
// kernel: tpu_custom_call.1
= control target key start
LH: loop header
LB: loop body
LE: loop exit
PB: predicated region body
PF: predicated region fallthrough
CT: control target
= control target key end

     0   :  { %7 = vsyncpa [#allocation3], 0  ;;  %s563_s0 = inlined_call_operand.vmem [shape: s32[16,1], index: 0, kind: input, shape index: {}]   ;;  %s564_s1 = inlined_call_operand.hbm [shape: f32[32,32], index: 1, kind: input, shape index: {}]   ;;  %s565_s2 = inlined_call_operand.hbm [shape: f32[16,32], index: 2, kind: output, shape index: {}]  }
   0x1   :  { %8 = vsyncpa [#allocation4], 0 }
   0x2   :  { %10 = vsyncpa [#allocation4 + $0x1], 0  ;;  %s468_s9 = smov 0   ;;  %s470_s10 = smov 0  }
   0x3   :  { %s472_s11 = smov 0   ;;  %s474_s12 = smov 0  }
   0x4 LB: > { %s489_s13 = sadd.s32 4294967295, %s446_s12   ;;  %s281_s14 = sadd.s32 4294967294, %s446_s12   ;;  %s446_s12 = sphi %s474_s12, %s571_s12   ;;  %s442_s11 = sphi %s472_s11, %s570_s11   ;;  %s438_s10 = sphi %s470_s10, %s569_s10   ;;  %s434_s9 = sphi %s468_s9, %s568_s9  }
   0x5   : > { %s493_s15 = sadd.s32 1, %s446_s12   ;;  %s70_s16 = sadd.s32 1, %s442_s11 }
   0x6   : > { %s67_s17 = ssub.s32 %s446_s12, %s493_s15  ;;  %p80_p0 = scmp.ne.s32.totalorder %s442_s11, %s438_s10 }
   0x7   : > { %p68_p1 = scmp.eq.s32.totalorder %s67_s17, 0  ;;  %p81_p2 = scmp.eq.s32.totalorder %s489_s13, 1 }
   0x8   : > { %p86_p3 = scmp.ne.s32.totalorder %s438_s10, %s434_s9  ;;  %p87_p4 = scmp.eq.s32.totalorder %s281_s14, 1 }
   0x9   : > { %s504_s18 = scalar_select %p68_p1, %s442_s11, %s70_s16  }
   0xa   : > { %p506_p5 = por %p81_p2, %p80_p0  ;;  %p510_p6 = por %p87_p4, %p86_p3 }
   0xb   : > { %p282_p7 = scmp.ge.s32.totalorder %s446_s12, 1  ;;  %p94_p8 = scmp.lt.s32.totalorder %s446_s12, 3 }
   0xc   : > { %p309_p9 = scmp.eq.s32.totalorder %s489_s13, 0  ;;  %s105_s23 = sshll.u32 %s564_s1, 4  ;;  %s106_s23 = int_to_ptr.hbm [resolvable:$true] %s105_s23 }
   0xd   : > { %p95_p10 = pnand %p282_p7, %p94_p8  ;;  %s448_s24 = smov [#allocation2]  }
   0xe   : > { %s107_s25 = sshll.u32 %s448_s24, 4  ;;  %s449_s26 = smov 128   ;;  %s108_s25 = int_to_ptr.vmem [resolvable:$true] %s107_s25 }
   0xf   : > { %p301_p11 = pneg %p95_p10  ;;  %s450_s27 = smov 8  }
  0x10   : > { %130 = sbr.rel (%p95_p10) target bundleno = 275 (0x113), region = 28 }
  0x11   : > { %p302_p12 = pnand %p309_p9, %p301_p11 }
  0x13   : > { %304 = dma.hbm_to_vmem [thread:$0]  (!%p302_p12), %s106_s23, 512, %s108_s25, [#allocation3], %s449_s26, %s449_s26, %s450_s27  }
  0x15   : > { %425 = dma.done.wait (%p309_p9), [#allocation3], 512  }
  0x16   : > { %427 = vsyncadd (%p309_p9), [#allocation3], 4294966784  ;;  %p152_p13 = scmp.lt.s32.totalorder %s489_s13, 1  ;;  %v451_v0 = vmov 0   ;;  %v168_v2 = vld [vmem:[#allocation2 + $0x18] sm:$0xff]  ;;  %v167_v3 = vld [vmem:[#allocation2 + $0x10] sm:$0xff]  ;;  %v157_v6 = vlaneseq }
  0x17   : > { %349 = vset.pattern.permute.xlu0 %v451_v0  ;;  %185 = vmatpush.msra.mxu0 %v168_v2  ;;  %v166_v4 = vld [vmem:[#allocation2 + $0x8] sm:$0xff]  ;;  %v165_v5 = vld [vmem:[#allocation2] sm:$0xff]  ;;  %vm169_vm0 = vcmask 261120   ;;  %v452_v9 = vmov 0.0   ;;  %s149_s5 = sand.u32 1, %s438_s10   ;;  %s292_s7 = sshll.u32 %s489_s13, 3 }
  0x18   : > { %s153_s28 = scalar_select %p152_p13, %s489_s13, 1  ;;  %v158_v7 = vand.u32 127, %v157_v6 }
  0x19   : > { %186 = vmatpush.msra.mxu0 %v167_v3  ;;  %s287_s6 = sshll.u32 %s149_s5, 3  ;;  %s205_s16 = scalar_lea.hbm %s565_s2, %s292_s7 }
  0x1a   : > { %s288_s29 = sshll.u32 %s153_s28, 3  ;;  %s151_s17 = scalar_lea.vmem [#allocation5], %s287_s6 }
  0x1b   : > { %s155_s4 = scalar_lea.vmem %s563_s0, %s288_s29  ;;  %187 = vmatpush.msra.mxu0 %v166_v4  ;;  %s207_s21 = sshll.u32 %s151_s17, 4  ;;  %s208_s21 = int_to_ptr.vmem [resolvable:$true] %s207_s21 }
  0x1c   : > { %v156_v1 = vld [vmem:[%s155_s4] sm:$0xff]  ;;  %s209_s22 = sshll.u32 %s205_s16, 4  ;;  %s195_s23 = scalar_lea.sflag [#allocation4], %s149_s5  ;;  %s210_s22 = int_to_ptr.hbm [resolvable:$true] %s209_s22 }
  0x1d   : > { %160 = vperm.xlu0 %349, %v156_v1   ;;  %188 = vmatpush.msra.mxu0 %v165_v5  ;;  %s394_s24 = sshra.s32 %s210_s22, 4  ;;  %s400_s27 = scalar_lea.hbm %s565_s2, 16  ;;  %s395_s24 = int_to_ptr.hbm [resolvable:$true] %s394_s24 }
  0x1e   : > { %s396_s25 = scalar_lea.hbm %s395_s24, 8  ;;  %p401_p3 = scmp.lt.s32.totalorder %s395_s24, %s565_s2 }
  0x1f   : > { %p397_p0 = scmp.ne.s32.totalorder %s395_s24, %s396_s25  ;;  %p402_p4 = scmp.lt.s32.totalorder %s400_s27, %s396_s25 }
  0x21   : > { %p398_p1 = pnand %p397_p0, %p506_p5  ;;  %p403_p7 = por %p402_p4, %p401_p3 }
  0x23   : > { %p399_p2 = pneg %p398_p1 }
  0x25   : > { %p404_p8 = pnand %p403_p7, %p399_p2 }
  0x8f   : > { %v161_v8 = vpop.permute.xlu0 %160 }
  0x90   : > { %vm162_vm1 = vcmp.eq.s32.totalorder %v158_v7, %v161_v8 }
  0x91   : > { %v289_v10 = vsel %vm162_vm1, 1.0, %v452_v9 }
  0x92   : > { %290 = vmatmul.msk.f32.vlgmr.msra.gmra.mxu0 %vm169_vm0, %v289_v10 }
 0x10f   : > { %v190_v11 = vpop.f32.mrf.mxu0 }
 0x110   : > { %193 = vst.msk [vmem:[%s151_s17] sm:$0xff] %vm169_vm0, %v190_v11 }
 0x111   : > { %407 = shalt.err (!%p404_p8)
}
 0x112   : > { %299 = dma.vmem_to_hbm [thread:$0]  (%p506_p5), %s208_s21, 128, %s210_s22, %s195_s23  }
 0x113 PF: > { %p311_p9 = scmp.ge.s32.totalorder %s446_s12, 2  ;;  %s221_s30 = sand.u32 1, %s434_s9  }
 0x114   : > { %s222_s3 = scalar_lea.sflag [#allocation4], %s221_s30 }
 0x115   : > { %p306_p10 = pnand %p311_p9, %p510_p6 }
 0x117   : > { %p307_p11 = pneg %p306_p10 }
 0x119   : > { %429 = dma.done.wait (%p307_p11), %s222_s3, 128  }
 0x11a   : > { %431 = vsyncadd (%p307_p11), %s222_s3, 4294967168  ;;  %p13_p12 = scmp.ge.s32.totalorder %s493_s15, 4   ;;  %s568_s9 = smov %s438_s10 }
 0x11b   : > { %s569_s10 = smov %s442_s11  ;;  %s570_s11 = smov %s504_s18 }
 0x11c   : > { %s571_s12 = smov %s493_s15  ;;  %15 = sbr.rel (!%p13_p12) target bundleno = 4 (0x4), region = 68 }
 0x121   :  { %228 = vsyncpa [#allocation3], 1 }
 0x122   :  { %230 = vsyncpa [#allocation3 + $0x1], 1 }
 0x123   :  { %231 = vsyncpa [#allocation4], 1 }
 0x124   :  { %233 = vsyncpa [#allocation4 + $0x1], 1 }

// kernel: tpu_custom_call.1
= control target key start
LH: loop header
LB: loop body
LE: loop exit
PB: predicated region body
PF: predicated region fallthrough
CT: control target
= control target key end

     0   :  { %7 = vsyncpa [#allocation3], 0  ;;  %s563_s0 = inlined_call_operand.vmem [shape: s32[16,1], index: 0, kind: input, shape index: {}]   ;;  %s564_s1 = inlined_call_operand.hbm [shape: f32[32,32], index: 1, kind: input, shape index: {}]   ;;  %s565_s2 = inlined_call_operand.hbm [shape: f32[16,32], index: 2, kind: output, shape index: {}]  }
   0x1   :  { %8 = vsyncpa [#allocation4], 0 }
   0x2   :  { %10 = vsyncpa [#allocation4 + $0x1], 0  ;;  %s468_s9 = smov 0   ;;  %s470_s10 = smov 0  }
   0x3   :  { %s472_s11 = smov 0   ;;  %s474_s12 = smov 0  }
   0x4 LB: > { %s489_s13 = sadd.s32 4294967295, %s446_s12   ;;  %s281_s14 = sadd.s32 4294967294, %s446_s12   ;;  %s446_s12 = sphi %s474_s12, %s571_s12   ;;  %s442_s11 = sphi %s472_s11, %s570_s11   ;;  %s438_s10 = sphi %s470_s10, %s569_s10   ;;  %s434_s9 = sphi %s468_s9, %s568_s9  }
   0x5   : > { %s493_s15 = sadd.s32 1, %s446_s12   ;;  %s70_s16 = sadd.s32 1, %s442_s11 }
   0x6   : > { %s67_s17 = ssub.s32 %s446_s12, %s493_s15  ;;  %p80_p0 = scmp.ne.s32.totalorder %s442_s11, %s438_s10 }
   0x7   : > { %p68_p1 = scmp.eq.s32.totalorder %s67_s17, 0  ;;  %p81_p2 = scmp.eq.s32.totalorder %s489_s13, 1 }
   0x8   : > { %p86_p3 = scmp.ne.s32.totalorder %s438_s10, %s434_s9  ;;  %p87_p4 = scmp.eq.s32.totalorder %s281_s14, 1 }
   0x9   : > { %s504_s18 = scalar_select %p68_p1, %s442_s11, %s70_s16  }
   0xa   : > { %p506_p5 = por %p81_p2, %p80_p0  ;;  %p510_p6 = por %p87_p4, %p86_p3 }
   0xb   : > { %p282_p7 = scmp.ge.s32.totalorder %s446_s12, 1  ;;  %p94_p8 = scmp.lt.s32.totalorder %s446_s12, 3 }
   0xc   : > { %p309_p9 = scmp.eq.s32.totalorder %s489_s13, 0  ;;  %s105_s23 = sshll.u32 %s564_s1, 4  ;;  %s106_s23 = int_to_ptr.hbm [resolvable:$true] %s105_s23 }
   0xd   : > { %p95_p10 = pnand %p282_p7, %p94_p8  ;;  %s448_s24 = smov [#allocation2]  }
   0xe   : > { %s107_s25 = sshll.u32 %s448_s24, 4  ;;  %s449_s26 = smov 128   ;;  %s108_s25 = int_to_ptr.vmem [resolvable:$true] %s107_s25 }
   0xf   : > { %p301_p11 = pneg %p95_p10  ;;  %s450_s27 = smov 8  }
  0x10   : > { %130 = sbr.rel (%p95_p10) target bundleno = 275 (0x113), region = 28 }
  0x11   : > { %p302_p12 = pnand %p309_p9, %p301_p11 }
  0x13   : > { %304 = dma.hbm_to_vmem [thread:$0]  (!%p302_p12), %s106_s23, 512, %s108_s25, [#allocation3], %s449_s26, %s449_s26, %s450_s27  }
  0x15   : > { %425 = dma.done.wait (%p309_p9), [#allocation3], 512  }
  0x16   : > { %427 = vsyncadd (%p309_p9), [#allocation3], 4294966784  ;;  %p152_p13 = scmp.lt.s32.totalorder %s489_s13, 1  ;;  %v451_v0 = vmov 0   ;;  %v168_v2 = vld [vmem:[#allocation2 + $0x18] sm:$0xff]  ;;  %v167_v3 = vld [vmem:[#allocation2 + $0x10] sm:$0xff]  ;;  %v157_v6 = vlaneseq }
  0x17   : > { %349 = vset.pattern.permute.xlu0 %v451_v0  ;;  %185 = vmatpush.msra.mxu0 %v168_v2  ;;  %v166_v4 = vld [vmem:[#allocation2 + $0x8] sm:$0xff]  ;;  %v165_v5 = vld [vmem:[#allocation2] sm:$0xff]  ;;  %vm169_vm0 = vcmask 261120   ;;  %v452_v9 = vmov 0.0   ;;  %s149_s5 = sand.u32 1, %s438_s10   ;;  %s292_s7 = sshll.u32 %s489_s13, 3 }
  0x18   : > { %s153_s28 = scalar_select %p152_p13, %s489_s13, 1  ;;  %v158_v7 = vand.u32 127, %v157_v6 }
  0x19   : > { %186 = vmatpush.msra.mxu0 %v167_v3  ;;  %s287_s6 = sshll.u32 %s149_s5, 3  ;;  %s205_s16 = scalar_lea.hbm %s565_s2, %s292_s7 }
  0x1a   : > { %s288_s29 = sshll.u32 %s153_s28, 3  ;;  %s151_s17 = scalar_lea.vmem [#allocation5], %s287_s6 }
  0x1b   : > { %s155_s4 = scalar_lea.vmem %s563_s0, %s288_s29  ;;  %187 = vmatpush.msra.mxu0 %v166_v4  ;;  %s207_s21 = sshll.u32 %s151_s17, 4  ;;  %s208_s21 = int_to_ptr.vmem [resolvable:$true] %s207_s21 }
  0x1c   : > { %v156_v1 = vld [vmem:[%s155_s4] sm:$0xff]  ;;  %s209_s22 = sshll.u32 %s205_s16, 4  ;;  %s195_s23 = scalar_lea.sflag [#allocation4], %s149_s5  ;;  %s210_s22 = int_to_ptr.hbm [resolvable:$true] %s209_s22 }
  0x1d   : > { %160 = vperm.xlu0 %349, %v156_v1   ;;  %188 = vmatpush.msra.mxu0 %v165_v5  ;;  %s394_s24 = sshra.s32 %s210_s22, 4  ;;  %s400_s27 = scalar_lea.hbm %s565_s2, 16  ;;  %s395_s24 = int_to_ptr.hbm [resolvable:$true] %s394_s24 }
  0x1e   : > { %s396_s25 = scalar_lea.hbm %s395_s24, 8  ;;  %p401_p3 = scmp.lt.s32.totalorder %s395_s24, %s565_s2 }
  0x1f   : > { %p397_p0 = scmp.ne.s32.totalorder %s395_s24, %s396_s25  ;;  %p402_p4 = scmp.lt.s32.totalorder %s400_s27, %s396_s25 }
  0x21   : > { %p398_p1 = pnand %p397_p0, %p506_p5  ;;  %p403_p7 = por %p402_p4, %p401_p3 }
  0x23   : > { %p399_p2 = pneg %p398_p1 }
  0x25   : > { %p404_p8 = pnand %p403_p7, %p399_p2 }
  0x8f   : > { %v161_v8 = vpop.permute.xlu0 %160 }
  0x90   : > { %vm162_vm1 = vcmp.eq.s32.totalorder %v158_v7, %v161_v8 }
  0x91   : > { %v289_v10 = vsel %vm162_vm1, 1.0, %v452_v9 }
  0x92   : > { %290 = vmatmul.msk.f32.vlgmr.msra.gmra.mxu0 %vm169_vm0, %v289_v10 }
 0x10f   : > { %v190_v11 = vpop.f32.mrf.mxu0 }
 0x110   : > { %193 = vst.msk [vmem:[%s151_s17] sm:$0xff] %vm169_vm0, %v190_v11 }
 0x111   : > { %407 = shalt.err (!%p404_p8)
}
 0x112   : > { %299 = dma.vmem_to_hbm [thread:$0]  (%p506_p5), %s208_s21, 128, %s210_s22, %s195_s23  }
 0x113 PF: > { %p311_p9 = scmp.ge.s32.totalorder %s446_s12, 2  ;;  %s221_s30 = sand.u32 1, %s434_s9  }
 0x114   : > { %s222_s3 = scalar_lea.sflag [#allocation4], %s221_s30 }
 0x115   : > { %p306_p10 = pnand %p311_p9, %p510_p6 }
 0x117   : > { %p307_p11 = pneg %p306_p10 }
 0x119   : > { %429 = dma.done.wait (%p307_p11), %s222_s3, 128  }
 0x11a   : > { %431 = vsyncadd (%p307_p11), %s222_s3, 4294967168  ;;  %p13_p12 = scmp.ge.s32.totalorder %s493_s15, 4   ;;  %s568_s9 = smov %s438_s10 }
 0x11b   : > { %s569_s10 = smov %s442_s11  ;;  %s570_s11 = smov %s504_s18 }
 0x11c   : > { %s571_s12 = smov %s493_s15  ;;  %15 = sbr.rel (!%p13_p12) target bundleno = 4 (0x4), region = 68 }
 0x121   :  { %228 = vsyncpa [#allocation3], 1 }
 0x122   :  { %230 = vsyncpa [#allocation3 + $0x1], 1 }
 0x123   :  { %231 = vsyncpa [#allocation4], 1 }
 0x124   :  { %233 = vsyncpa [#allocation4 + $0x1], 1 }

</bundles_post_ra>
